<compile_context>
chip_gen: v7x
topology: tpu7x:2x2x1
jax: 0.10.0
libtpu: 0.0.40
codegen_flags: <defaults>
</compile_context>

<pallas_src>
import jax
import jax.numpy as jnp
from jax.experimental import pallas as pl
from jax.experimental.pallas import tpu as pltpu

_TB_CAP = 2048  # max super-rows per grid step (VMEM use stays ~10 MiB double-buffered)


def _default_row_pack():
    # 8-row packing (384/256-lane tiles) on v6e/v7x; conservative 4 elsewhere
    # (v5e's f32 MXU path is weak — extra zero-fill flops could flip the kernel
    # from HBM-bound to MXU-bound).
    try:
        kind = jax.devices()[0].device_kind.lower()
    except Exception:
        return 4
    if "v6" in kind or "v7" in kind:
        return 8
    return 4


def _pick_tile(rows):
    if rows <= 8:
        return rows
    # Aim for >=4 grid steps (two TensorCores on v7x + intra-core pipelining),
    # rounded down to a multiple of 8, capped at _TB_CAP, floor of 8.
    quarter = (rows + 3) // 4
    tb = (quarter // 8) * 8
    return max(8, min(_TB_CAP, tb))


def _relu_mm2_kernel(x_ref, y_ref, wx_ref, wy_ref, o_ref):
    # o = relu(x @ wx + y @ wy), f32 accumulation on the MXU.
    acc = jnp.dot(x_ref[...], wx_ref[...], preferred_element_type=jnp.float32)
    acc = acc + jnp.dot(y_ref[...], wy_ref[...], preferred_element_type=jnp.float32)
    o_ref[...] = jnp.maximum(acc, 0.0).astype(o_ref.dtype)


def _relu_mm2(x2d, y2d, wx, wy, tb):
    rows, kx = x2d.shape
    ky = y2d.shape[1]
    n = wx.shape[1]
    itemsize = jnp.dtype(x2d.dtype).itemsize
    cost = pl.CostEstimate(
        flops=2 * rows * (kx + ky) * n,
        transcendentals=0,
        bytes_accessed=(rows * kx + rows * ky + kx * n + ky * n + rows * n) * itemsize,
    )
    return pl.pallas_call(
        _relu_mm2_kernel,
        out_shape=jax.ShapeDtypeStruct((rows, n), x2d.dtype),
        grid_spec=pltpu.PrefetchScalarGridSpec(
            num_scalar_prefetch=0,
            grid=(pl.cdiv(rows, tb),),
            in_specs=[
                pl.BlockSpec((tb, kx), lambda i: (i, 0)),
                pl.BlockSpec((tb, ky), lambda i: (i, 0)),
                pl.BlockSpec((kx, n), lambda i: (0, 0)),   # weights stay VMEM-resident
                pl.BlockSpec((ky, n), lambda i: (0, 0)),
            ],
            out_specs=pl.BlockSpec((tb, n), lambda i: (i, 0)),
        ),
        compiler_params=pltpu.CompilerParams(
            dimension_semantics=("parallel",)),
        cost_estimate=cost,
    )(x2d, y2d, wx, wy)


def make_fused_mlp(w0, w1, row_pack=None):
    """w0:(32,16), w1:(32,32) in PyTorch Linear layout (out,in). Returns jitted fwd(x,y)."""
    if row_pack is None:
        row_pack = _default_row_pack()

    # ---- Weight prep hoisted out of the per-call path (jit constants) ----
    w0_t = jnp.asarray(w0).T                                          # (16, 32)
    w1_t = jnp.asarray(w1).T                                          # (32, 32)
    w01 = jnp.dot(w0_t, w1_t,
                  preferred_element_type=jnp.float32).astype(w0_t.dtype)  # (16, 32)
    kx, n = w01.shape
    ky = w1_t.shape[0]
    eye = jnp.eye(row_pack, dtype=w01.dtype)
    wx_d = jnp.kron(eye, w01)                                         # (P*16, P*32)
    wy_d = jnp.kron(eye, w1_t)                                        # (P*32, P*32)

    def fwd(x, y):
        b = x.shape[0]
        if b % row_pack == 0 and b >= row_pack:
            # Lane-dense path: P rows per super-row; output (B/P, P*32) is the
            # row-major reinterpretation of (B, 32), so the reshapes are free.
            rows = b // row_pack
            xr = x.reshape(rows, row_pack * kx)
            yr = y.reshape(rows, row_pack * ky)
            out = _relu_mm2(xr, yr, wx_d, wy_d, _pick_tile(rows))
            return out.reshape(b, n)
        # Fallback for tiny / odd batches: plain (B,16)x(16,32) + (B,32)x(32,32).
        return _relu_mm2(x, y, w01, w1_t, _pick_tile(b))

    return jax.jit(fwd)


if __name__ == "__main__":
    key = jax.random.PRNGKey(0)
    k_x, k_y, k_w0, k_w1 = jax.random.split(key, 4)

    # Params in PyTorch Linear layout (out, in), kaiming-uniform-like bounds.
    w0 = jax.random.uniform(k_w0, (32, 16), dtype=jnp.float32,
                            minval=-0.25, maxval=0.25)
    w1 = jax.random.uniform(k_w1, (32, 32), dtype=jnp.float32,
                            minval=-1.0 / (32 ** 0.5), maxval=1.0 / (32 ** 0.5))

    fwd = make_fused_mlp(w0, w1)

    def reference(x, y):
        return jnp.maximum((x @ w0.T + y) @ w1.T, 0.0)

    # 1) Packed lane-dense path with a multi-step grid.
    B = 4096
    x = jax.random.normal(k_x, (B, 16), dtype=jnp.float32)
    y = jax.random.normal(k_y, (B, 32), dtype=jnp.float32)
    out = jax.block_until_ready(fwd(x, y))
    ref = reference(x, y)
    assert out.shape == (B, 32)
    assert jnp.allclose(out, ref, atol=1e-4, rtol=1e-4), \
        float(jnp.max(jnp.abs(out - ref)))

    # 2) Ragged batch (not a multiple of 8 / row_pack): exercises the masked
    #    partial last block of the fallback path.
    B2 = 12
    x2 = jax.random.normal(k_x, (B2, 16), dtype=jnp.float32)
    y2 = jax.random.normal(k_y, (B2, 32), dtype=jnp.float32)
    out2 = jax.block_until_ready(fwd(x2, y2))
    ref2 = reference(x2, y2)
    assert out2.shape == (B2, 32)
    assert jnp.allclose(out2, ref2, atol=1e-4, rtol=1e-4), \
        float(jnp.max(jnp.abs(out2 - ref2)))

    # 3) Module's original shape (batch=1).
    x1 = jax.random.normal(k_x, (1, 16), dtype=jnp.float32)
    y1 = jax.random.normal(k_y, (1, 32), dtype=jnp.float32)
    out1 = jax.block_until_ready(fwd(x1, y1))
    ref1 = reference(x1, y1)
    assert out1.shape == (1, 32)
    assert jnp.allclose(out1, ref1, atol=1e-4, rtol=1e-4), \
        float(jnp.max(jnp.abs(out1 - ref1)))

    print("KERNEL_OK")
</pallas_src>

<mosaic_0001>
module attributes {stable_mosaic.version = 11 : i64} {
  func.func @_relu_mm2_kernel(%arg0: i32, %arg1: memref<256x64xf32, #tpu.memory_space<vmem>>, %arg2: memref<256x128xf32, #tpu.memory_space<vmem>>, %arg3: memref<64x128xf32, #tpu.memory_space<vmem>>, %arg4: memref<128x128xf32, #tpu.memory_space<vmem>>, %arg5: memref<256x128xf32, #tpu.memory_space<vmem>>) attributes {dimension_semantics = [#tpu.dimension_semantics<parallel>], iteration_bounds = array<i64: 4>, scalar_prefetch = 0 : i64, scratch_operands = 0 : i64, tpu.core_type = #tpu.core_type<tc>, window_params = [{transform_indices = @transform_0, window_bounds = array<i64: 256, 64>}, {transform_indices = @transform_1, window_bounds = array<i64: 256, 128>}, {pipeline_mode = #tpu.pipeline_mode<synchronous>, transform_indices = @transform_2, window_bounds = array<i64: 64, 128>}, {pipeline_mode = #tpu.pipeline_mode<synchronous>, transform_indices = @transform_3, window_bounds = array<i64: 128, 128>}, {transform_indices = @transform_4, window_bounds = array<i64: 256, 128>}]} {
    %c0 = arith.constant 0 : index
    %c0_0 = arith.constant 0 : index
    %0 = vector.load %arg1[%c0, %c0_0] : memref<256x64xf32, #tpu.memory_space<vmem>>, vector<256x64xf32>
    %c0_1 = arith.constant 0 : index
    %c0_2 = arith.constant 0 : index
    %1 = vector.load %arg3[%c0_1, %c0_2] : memref<64x128xf32, #tpu.memory_space<vmem>>, vector<64x128xf32>
    %cst = arith.constant dense<0.000000e+00> : vector<256x128xf32>
    %2 = tpu.matmul %0, %1, %cst {dimension_numbers = #tpu.dot_dimension_numbers<[1], [0], [0], [1], [0, 0, 1, 1], [], []>} : vector<256x64xf32>, vector<64x128xf32>, vector<256x128xf32> -> vector<256x128xf32>
    %c0_3 = arith.constant 0 : index
    %c0_4 = arith.constant 0 : index
    %3 = vector.load %arg2[%c0_3, %c0_4] : memref<256x128xf32, #tpu.memory_space<vmem>>, vector<256x128xf32>
    %c0_5 = arith.constant 0 : index
    %c0_6 = arith.constant 0 : index
    %4 = vector.load %arg4[%c0_5, %c0_6] : memref<128x128xf32, #tpu.memory_space<vmem>>, vector<128x128xf32>
    %cst_7 = arith.constant dense<0.000000e+00> : vector<256x128xf32>
    %5 = tpu.matmul %3, %4, %cst_7 {dimension_numbers = #tpu.dot_dimension_numbers<[1], [0], [0], [1], [0, 0, 1, 1], [], []>} : vector<256x128xf32>, vector<128x128xf32>, vector<256x128xf32> -> vector<256x128xf32>
    %6 = arith.addf %2, %5 : vector<256x128xf32>
    %cst_8 = arith.constant 0.000000e+00 : f32
    %7 = vector.broadcast %cst_8 : f32 to vector<256x128xf32>
    %8 = arith.maximumf %6, %7 : vector<256x128xf32>
    %c0_9 = arith.constant 0 : index
    %c0_10 = arith.constant 0 : index
    %9 = vector.load %arg5[%c0_9, %c0_10] : memref<256x128xf32, #tpu.memory_space<vmem>>, vector<256x128xf32>
    tpu.vector_store %arg5[%c0_9, %c0_10], %8 {strides = array<i32>} : memref<256x128xf32, #tpu.memory_space<vmem>>, vector<256x128xf32>,
    return
  }
  func.func @transform_0(%arg0: i32) -> (i32, i32) {
    %c0_i32 = arith.constant 0 : i32
    %c0_i32_0 = arith.constant 0 : i32
    return %arg0, %c0_i32 : i32, i32
  }
  func.func @transform_1(%arg0: i32) -> (i32, i32) {
    %c0_i32 = arith.constant 0 : i32
    %c0_i32_0 = arith.constant 0 : i32
    return %arg0, %c0_i32 : i32, i32
  }
  func.func @transform_2(%arg0: i32) -> (i32, i32) {
    %c0_i32 = arith.constant 0 : i32
    %c0_i32_0 = arith.constant 0 : i32
    %c0_i32_1 = arith.constant 0 : i32
    return %c0_i32, %c0_i32_0 : i32, i32
  }
  func.func @transform_3(%arg0: i32) -> (i32, i32) {
    %c0_i32 = arith.constant 0 : i32
    %c0_i32_0 = arith.constant 0 : i32
    %c0_i32_1 = arith.constant 0 : i32
    return %c0_i32, %c0_i32_0 : i32, i32
  }
  func.func @transform_4(%arg0: i32) -> (i32, i32) {
    %c0_i32 = arith.constant 0 : i32
    %c0_i32_0 = arith.constant 0 : i32
    return %arg0, %c0_i32 : i32, i32
  }
}

</mosaic_0001>

<bundles_post_ra>
// kernel: fwd.1
= control target key start
LH: loop header
LB: loop body
LE: loop exit
PB: predicated region body
PF: predicated region fallthrough
CT: control target
= control target key end

     0   :  { %s1388_s15 = smov 0   ;;  %s1619_s0 = inlined_call_operand.vmem [shape: f32[1024,64], index: 0, kind: input, shape index: {}]   ;;  %s1620_s1 = inlined_call_operand.vmem [shape: f32[1024,128], index: 1, kind: input, shape index: {}]   ;;  %s1621_s2 = inlined_call_operand.vmem [shape: f32[64,128], index: 2, kind: input, shape index: {}]   ;;  %s1622_s3 = inlined_call_operand.vmem [shape: f32[128,128], index: 3, kind: input, shape index: {}]   ;;  %s1623_s4 = inlined_call_operand.vmem [shape: f32[1024,128], index: 4, kind: output, shape index: {}]  }
   0x1 LB: > { %s990_s16 = sadd.s32 4294967295, %s1361_s15   ;;  %p994_p0 = scmp.ge.s32.totalorder %s1361_s15, 1  ;;  %s1361_s15 = sphi %s1388_s15, %s14_s15  }
   0x2   : > { %p174_p1 = scmp.lt.s32.totalorder %s1361_s15, 5 }
   0x4   : > { %p175_p2 = pnand %p994_p0, %p174_p1 }
   0x5   : > { %v295_v0 = vld [vmem:[%s1622_s3] sm:$0xff] (!%p175_p2)  ;;  %v296_v1 = vld [vmem:[%s1622_s3 + $0x8] sm:$0xff] (!%p175_p2)  ;;  %v297_v2 = vld [vmem:[%s1622_s3 + $0x10] sm:$0xff] (!%p175_p2)  ;;  %s995_s23 = sshll.u32 (!%p175_p2), %s990_s16, 5  ;;  %vm536_vm0 = vcmask (!%p175_p2), 523264  }
   0x6   : > { %178 = sbr.rel (%p175_p2) target bundleno = 318 (0x13e), region = 36  ;;  %v1267_v3 = vpack.c.bf16 (!%p175_p2), %v296_v1, %v295_v0  ;;  %v298_v4 = vld [vmem:[%s1622_s3 + $0x18] sm:$0xff] (!%p175_p2)  ;;  %p206_p3 = scmp.lt.s32.totalorder (!%p175_p2), %s995_s23, 127  ;;  %v299_v6 = vld [vmem:[%s1622_s3 + $0x20] sm:$0xff] (!%p175_p2)  ;;  %v300_v7 = vld [vmem:[%s1622_s3 + $0x28] sm:$0xff] (!%p175_p2) }
   0x7   : > { %v1271_v5 = vpack.c.bf16 (!%p175_p2), %v298_v4, %v297_v2  ;;  %v255_v8 = vld [vmem:[%s1621_s2] sm:$0xff] (!%p175_p2)  ;;  %v256_v9 = vld [vmem:[%s1621_s2 + $0x8] sm:$0xff] (!%p175_p2)  ;;  %v257_v11 = vld [vmem:[%s1621_s2 + $0x10] sm:$0xff] (!%p175_p2)  ;;  %v1275_v13 = vpack.c.bf16 (!%p175_p2), %v300_v7, %v299_v6 }
   0x8   : > { %1268 = vmatprep.subr.bf16.mxu1 (!%p175_p2), %v1267_v3  ;;  %v1299_v10 = vpack.c.bf16 (!%p175_p2), %v256_v9, %v255_v8  ;;  %v258_v12 = vld [vmem:[%s1621_s2 + $0x18] sm:$0xff] (!%p175_p2)  ;;  %v259_v15 = vld [vmem:[%s1621_s2 + $0x20] sm:$0xff] (!%p175_p2)  ;;  %v260_v16 = vld [vmem:[%s1621_s2 + $0x28] sm:$0xff] (!%p175_p2) }
   0x9   : > { %1270 = vmatpush3.bf16.msra.mxu1 (!%p175_p2), %v1267_v3  ;;  %v1303_v14 = vpack.c.bf16 (!%p175_p2), %v258_v12, %v257_v11  ;;  %v301_v17 = vld [vmem:[%s1622_s3 + $0x30] sm:$0xff] (!%p175_p2)  ;;  %v302_v18 = vld [vmem:[%s1622_s3 + $0x38] sm:$0xff] (!%p175_p2)  ;;  %v1307_v19 = vpack.c.bf16 (!%p175_p2), %v260_v16, %v259_v15  ;;  %v303_v25 = vld [vmem:[%s1622_s3 + $0x40] sm:$0xff] (!%p175_p2) }
   0xa   : > { %1272 = vmatprep.subr.bf16.mxu1 (!%p175_p2), %v1271_v5  ;;  %1300 = vmatprep.subr.bf16.mxu0 (!%p175_p2), %v1299_v10  ;;  %v1279_v22 = vpack.c.bf16 (!%p175_p2), %v302_v18, %v301_v17  ;;  %v261_v23 = vld [vmem:[%s1621_s2 + $0x30] sm:$0xff] (!%p175_p2)  ;;  %v262_v24 = vld [vmem:[%s1621_s2 + $0x38] sm:$0xff] (!%p175_p2)  ;;  %v304_v26 = vld [vmem:[%s1622_s3 + $0x48] sm:$0xff] (!%p175_p2) }
   0xb   : > { %1302 = vmatpush3.bf16.msra.mxu0 (!%p175_p2), %v1299_v10  ;;  %v1311_v27 = vpack.c.bf16 (!%p175_p2), %v262_v24, %v261_v23  ;;  %v1283_v28 = vpack.c.bf16 (!%p175_p2), %v304_v26, %v303_v25  ;;  %v305_v29 = vld [vmem:[%s1622_s3 + $0x50] sm:$0xff] (!%p175_p2)  ;;  %v306_v30 = vld [vmem:[%s1622_s3 + $0x58] sm:$0xff] (!%p175_p2)  ;;  %v307_v32 = vld [vmem:[%s1622_s3 + $0x60] sm:$0xff] (!%p175_p2) }
   0xc   : > { %1304 = vmatprep.subr.bf16.mxu0 (!%p175_p2), %v1303_v14  ;;  %v1287_v31 = vpack.c.bf16 (!%p175_p2), %v306_v30, %v305_v29  ;;  %v308_v33 = vld [vmem:[%s1622_s3 + $0x68] sm:$0xff] (!%p175_p2)  ;;  %v309_v37 = vld [vmem:[%s1622_s3 + $0x70] sm:$0xff] (!%p175_p2)  ;;  %v310_v38 = vld [vmem:[%s1622_s3 + $0x78] sm:$0xff] (!%p175_p2) }
   0xd   : > { %s1625_s23 = smov (!%p206_p3, %s995_s23), 127  ;;  %1274 = vmatpush3.bf16.msra.mxu1 %v1271_v5  ;;  %v1291_v36 = vpack.c.bf16 %v308_v33, %v307_v32  ;;  %v1295_v41 = vpack.c.bf16 %v310_v38, %v309_v37 }
   0xe   : > { %s1432_s17 = sshll.u32 %s1625_s23, 3  ;;  %1276 = vmatprep.subr.bf16.mxu1 %v1275_v13 }
   0xf   : > { %s1444_s25 = scalar_lea.vmem %s1619_s0, %s1432_s17  ;;  %s1450_s27 = scalar_lea.vmem %s1620_s1, %s1432_s17  ;;  %1306 = vmatpush3.bf16.msra.mxu0 %v1303_v14 }
  0x10   : > { %v223_v20 = vld [vmem:[%s1444_s25] sm:$0xff]  ;;  %1308 = vmatprep.subr.bf16.mxu0 %v1307_v19  ;;  %v224_v34 = vld [vmem:[%s1444_s25 + $0x8] sm:$0xff]  ;;  %v225_v35 = vld [vmem:[%s1444_s25 + $0x10] sm:$0xff]  ;;  %s1582_s26 = scalar_lea.vmem %s1623_s4, %s1432_s17 }
  0x11   : > { %v263_v21 = vld [vmem:[%s1450_s27] sm:$0xff]  ;;  %1219 = vmatprep.mubr.msk.f32.mxu0 %vm536_vm0, %v223_v20  ;;  %1278 = vmatpush3.bf16.msra.mxu1 %v1275_v13  ;;  %v226_v39 = vld [vmem:[%s1444_s25 + $0x18] sm:$0xff]  ;;  %v228_v42 = vld [vmem:[%s1444_s25 + $0x28] sm:$0xff] }
  0x12   : > { %1155 = vmatprep.mubr.f32.mxu1 %v263_v21  ;;  %1280 = vmatprep.subr.bf16.mxu1 %v1279_v22  ;;  %v227_v40 = vld [vmem:[%s1444_s25 + $0x20] sm:$0xff]  ;;  %v229_v43 = vld [vmem:[%s1444_s25 + $0x30] sm:$0xff]  ;;  %v230_v44 = vld [vmem:[%s1444_s25 + $0x38] sm:$0xff] }
  0x13   : > { %1310 = vmatpush3.bf16.msra.mxu0 %v1307_v19  ;;  %v264_v45 = vld [vmem:[%s1450_s27 + $0x8] sm:$0xff]  ;;  %v231_v46 = vld [vmem:[%s1444_s25 + $0x40] sm:$0xff]  ;;  %v265_v47 = vld [vmem:[%s1450_s27 + $0x10] sm:$0xff] }
  0x14   : > { %1312 = vmatprep.subr.bf16.mxu0 %v1311_v27  ;;  %v232_v48 = vld [vmem:[%s1444_s25 + $0x48] sm:$0xff]  ;;  %v266_v49 = vld [vmem:[%s1450_s27 + $0x18] sm:$0xff]  ;;  %v233_v50 = vld [vmem:[%s1444_s25 + $0x50] sm:$0xff] }
  0x15   : > { %1282 = vmatpush3.bf16.msra.mxu1 %v1279_v22  ;;  %v267_v51 = vld [vmem:[%s1450_s27 + $0x20] sm:$0xff]  ;;  %v234_v52 = vld [vmem:[%s1444_s25 + $0x58] sm:$0xff]  ;;  %v268_v53 = vld [vmem:[%s1450_s27 + $0x28] sm:$0xff] }
  0x16   : > { %1284 = vmatprep.subr.bf16.mxu1 %v1283_v28  ;;  %v235_v54 = vld [vmem:[%s1444_s25 + $0x60] sm:$0xff]  ;;  %v269_v55 = vld [vmem:[%s1450_s27 + $0x30] sm:$0xff]  ;;  %v236_v56 = vld [vmem:[%s1444_s25 + $0x68] sm:$0xff] }
  0x17   : > { %1314 = vmatpush3.bf16.msra.mxu0 %v1311_v27  ;;  %v270_v57 = vld [vmem:[%s1450_s27 + $0x38] sm:$0xff]  ;;  %v237_v58 = vld [vmem:[%s1444_s25 + $0x70] sm:$0xff]  ;;  %v271_v59 = vld [vmem:[%s1450_s27 + $0x40] sm:$0xff] }
  0x18   : > { %v238_v60 = vld [vmem:[%s1444_s25 + $0x78] sm:$0xff]  ;;  %v272_v61 = vld [vmem:[%s1450_s27 + $0x48] sm:$0xff]  ;;  %v239_v62 = vld [vmem:[%s1444_s25 + $0x80] sm:$0xff] }
  0x19   : > { %1286 = vmatpush3.bf16.msra.mxu1 %v1283_v28  ;;  %v273_v63 = vld [vmem:[%s1450_s27 + $0x50] sm:$0xff]  ;;  %v240_v0 = vld [vmem:[%s1444_s25 + $0x88] sm:$0xff]  ;;  %v274_v1 = vld [vmem:[%s1450_s27 + $0x58] sm:$0xff] }
  0x1a   : > { %1288 = vmatprep.subr.bf16.mxu1 %v1287_v31  ;;  %1220 = vmatmul.mubr.msk.f32.vlgmr.msra.gmra.mrb[0].mxu0 %vm536_vm0, %v224_v34  ;;  %v241_v2 = vld [vmem:[%s1444_s25 + $0x90] sm:$0xff]  ;;  %v275_v3 = vld [vmem:[%s1450_s27 + $0x60] sm:$0xff]  ;;  %v242_v4 = vld [vmem:[%s1444_s25 + $0x98] sm:$0xff] }
  0x1b   : > { %1222 = vmatprep.mubr.msk.f32.mxu0 %vm536_vm0, %v225_v35  ;;  %v276_v5 = vld [vmem:[%s1450_s27 + $0x68] sm:$0xff]  ;;  %v243_v6 = vld [vmem:[%s1444_s25 + $0xa0] sm:$0xff]  ;;  %v277_v7 = vld [vmem:[%s1450_s27 + $0x70] sm:$0xff] }
  0x1c   : > { %v244_v8 = vld [vmem:[%s1444_s25 + $0xa8] sm:$0xff]  ;;  %v278_v9 = vld [vmem:[%s1450_s27 + $0x78] sm:$0xff]  ;;  %v245_v10 = vld [vmem:[%s1444_s25 + $0xb0] sm:$0xff] }
  0x1d   : > { %1290 = vmatpush3.bf16.msra.mxu1 %v1287_v31  ;;  %v279_v11 = vld [vmem:[%s1450_s27 + $0x80] sm:$0xff]  ;;  %v246_v12 = vld [vmem:[%s1444_s25 + $0xb8] sm:$0xff]  ;;  %v280_v13 = vld [vmem:[%s1450_s27 + $0x88] sm:$0xff] }
  0x1e   : > { %1292 = vmatprep.subr.bf16.mxu1 %v1291_v36  ;;  %1223 = vmatmul.mubr.msk.f32.gmra.mrb[2].mxu0 %vm536_vm0, %v226_v39  ;;  %v247_v14 = vld [vmem:[%s1444_s25 + $0xc0] sm:$0xff]  ;;  %v281_v15 = vld [vmem:[%s1450_s27 + $0x90] sm:$0xff]  ;;  %v248_v16 = vld [vmem:[%s1444_s25 + $0xc8] sm:$0xff] }
  0x1f   : > { %1225 = vmatprep.mubr.msk.f32.mxu0 %vm536_vm0, %v227_v40  ;;  %v282_v17 = vld [vmem:[%s1450_s27 + $0x98] sm:$0xff]  ;;  %v249_v18 = vld [vmem:[%s1444_s25 + $0xd0] sm:$0xff]  ;;  %v283_v19 = vld [vmem:[%s1450_s27 + $0xa0] sm:$0xff] }
  0x20   : > { %v250_v20 = vld [vmem:[%s1444_s25 + $0xd8] sm:$0xff]  ;;  %v284_v21 = vld [vmem:[%s1450_s27 + $0xa8] sm:$0xff]  ;;  %v251_v22 = vld [vmem:[%s1444_s25 + $0xe0] sm:$0xff] }
  0x21   : > { %1294 = vmatpush3.bf16.msra.mxu1 %v1291_v36  ;;  %v285_v23 = vld [vmem:[%s1450_s27 + $0xb0] sm:$0xff]  ;;  %v252_v24 = vld [vmem:[%s1444_s25 + $0xe8] sm:$0xff]  ;;  %v286_v25 = vld [vmem:[%s1450_s27 + $0xb8] sm:$0xff] }
  0x22   : > { %1296 = vmatprep.subr.bf16.mxu1 %v1295_v41  ;;  %1226 = vmatmul.mubr.msk.f32.gmra.mrb[4].mxu0 %vm536_vm0, %v228_v42  ;;  %v253_v26 = vld [vmem:[%s1444_s25 + $0xf0] sm:$0xff]  ;;  %v287_v27 = vld [vmem:[%s1450_s27 + $0xc0] sm:$0xff]  ;;  %v254_v28 = vld [vmem:[%s1444_s25 + $0xf8] sm:$0xff] }
  0x23   : > { %1228 = vmatprep.mubr.msk.f32.mxu0 %vm536_vm0, %v229_v43  ;;  %v288_v29 = vld [vmem:[%s1450_s27 + $0xc8] sm:$0xff]  ;;  %v289_v30 = vld [vmem:[%s1450_s27 + $0xd0] sm:$0xff]  ;;  %v290_v31 = vld [vmem:[%s1450_s27 + $0xd8] sm:$0xff] }
  0x24   : > { %v291_v32 = vld [vmem:[%s1450_s27 + $0xe0] sm:$0xff]  ;;  %v292_v33 = vld [vmem:[%s1450_s27 + $0xe8] sm:$0xff]  ;;  %v293_v34 = vld [vmem:[%s1450_s27 + $0xf0] sm:$0xff] }
  0x25   : > { %1298 = vmatpush3.bf16.msra.mxu1 %v1295_v41  ;;  %v294_v35 = vld [vmem:[%s1450_s27 + $0xf8] sm:$0xff] }
  0x26   : > { %1229 = vmatmul.mubr.msk.f32.gmra.mrb[6].mxu0 %vm536_vm0, %v230_v44 }
  0x27   : > { %1231 = vmatprep.mubr.msk.f32.mxu0 %vm536_vm0, %v231_v46 }
  0x28   : > { %1156 = vmatmul.mubr.f32.vlgmr.msra.gmra.mrb[0].mxu1 %v264_v45 }
  0x29   : > { %1158 = vmatprep.mubr.f32.mxu1 %v265_v47 }
  0x2a   : > { %1232 = vmatmul.mubr.msk.f32.gmra.mrb[8].mxu0 %vm536_vm0, %v232_v48 }
  0x2b   : > { %1234 = vmatprep.mubr.msk.f32.mxu0 %vm536_vm0, %v233_v50 }
  0x2c   : > { %1159 = vmatmul.mubr.f32.gmra.mrb[2].mxu1 %v266_v49 }
  0x2d   : > { %1161 = vmatprep.mubr.f32.mxu1 %v267_v51 }
  0x2e   : > { %1235 = vmatmul.mubr.msk.f32.gmra.mrb[10].mxu0 %vm536_vm0, %v234_v52 }
  0x2f   : > { %1237 = vmatprep.mubr.msk.f32.mxu0 %vm536_vm0, %v235_v54 }
  0x30   : > { %1162 = vmatmul.mubr.f32.gmra.mrb[4].mxu1 %v268_v53 }
  0x31   : > { %1164 = vmatprep.mubr.f32.mxu1 %v269_v55 }
  0x32   : > { %1238 = vmatmul.mubr.msk.f32.gmra.mrb[12].mxu0 %vm536_vm0, %v236_v56 }
  0x33   : > { %1240 = vmatprep.mubr.msk.f32.mxu0 %vm536_vm0, %v237_v58 }
  0x34   : > { %1165 = vmatmul.mubr.f32.gmra.mrb[6].mxu1 %v270_v57 }
  0x35   : > { %1167 = vmatprep.mubr.f32.mxu1 %v271_v59 }
  0x36   : > { %1241 = vmatmul.mubr.msk.f32.gmra.mrb[14].mxu0 %vm536_vm0, %v238_v60 }
  0x37   : > { %1243 = vmatprep.mubr.msk.f32.mxu0 %vm536_vm0, %v239_v62 }
  0x38   : > { %1168 = vmatmul.mubr.f32.gmra.mrb[8].mxu1 %v272_v61 }
  0x39   : > { %1170 = vmatprep.mubr.f32.mxu1 %v273_v63 }
  0x3a   : > { %1244 = vmatmul.mubr.msk.f32.gmra.mrb[16].mxu0 %vm536_vm0, %v240_v0 }
  0x3b   : > { %1246 = vmatprep.mubr.msk.f32.mxu0 %vm536_vm0, %v241_v2 }
  0x3c   : > { %1171 = vmatmul.mubr.f32.gmra.mrb[10].mxu1 %v274_v1 }
  0x3d   : > { %1173 = vmatprep.mubr.f32.mxu1 %v275_v3 }
  0x3e   : > { %1247 = vmatmul.mubr.msk.f32.gmra.mrb[18].mxu0 %vm536_vm0, %v242_v4 }
  0x3f   : > { %1249 = vmatprep.mubr.msk.f32.mxu0 %vm536_vm0, %v243_v6 }
  0x40   : > { %1174 = vmatmul.mubr.f32.gmra.mrb[12].mxu1 %v276_v5 }
  0x41   : > { %1176 = vmatprep.mubr.f32.mxu1 %v277_v7 }
  0x42   : > { %1250 = vmatmul.mubr.msk.f32.gmra.mrb[20].mxu0 %vm536_vm0, %v244_v8 }
  0x43   : > { %1252 = vmatprep.mubr.msk.f32.mxu0 %vm536_vm0, %v245_v10 }
  0x44   : > { %1177 = vmatmul.mubr.f32.gmra.mrb[14].mxu1 %v278_v9 }
  0x45   : > { %1179 = vmatprep.mubr.f32.mxu1 %v279_v11 }
  0x46   : > { %1253 = vmatmul.mubr.msk.f32.gmra.mrb[22].mxu0 %vm536_vm0, %v246_v12 }
  0x47   : > { %1255 = vmatprep.mubr.msk.f32.mxu0 %vm536_vm0, %v247_v14 }
  0x48   : > { %1180 = vmatmul.mubr.f32.gmra.mrb[16].mxu1 %v280_v13 }
  0x49   : > { %1182 = vmatprep.mubr.f32.mxu1 %v281_v15 }
  0x4a   : > { %1256 = vmatmul.mubr.msk.f32.gmra.mrb[24].mxu0 %vm536_vm0, %v248_v16 }
  0x4b   : > { %1258 = vmatprep.mubr.msk.f32.mxu0 %vm536_vm0, %v249_v18 }
  0x4c   : > { %1183 = vmatmul.mubr.f32.gmra.mrb[18].mxu1 %v282_v17 }
  0x4d   : > { %1185 = vmatprep.mubr.f32.mxu1 %v283_v19 }
  0x4e   : > { %1259 = vmatmul.mubr.msk.f32.gmra.mrb[26].mxu0 %vm536_vm0, %v250_v20 }
  0x4f   : > { %1261 = vmatprep.mubr.msk.f32.mxu0 %vm536_vm0, %v251_v22 }
  0x50   : > { %1186 = vmatmul.mubr.f32.gmra.mrb[20].mxu1 %v284_v21 }
  0x51   : > { %1188 = vmatprep.mubr.f32.mxu1 %v285_v23 }
  0x52   : > { %1262 = vmatmul.mubr.msk.f32.gmra.mrb[28].mxu0 %vm536_vm0, %v252_v24 }
  0x53   : > { %1264 = vmatprep.mubr.msk.f32.mxu0 %vm536_vm0, %v253_v26 }
  0x54   : > { %1189 = vmatmul.mubr.f32.gmra.mrb[22].mxu1 %v286_v25 }
  0x55   : > { %1191 = vmatprep.mubr.f32.mxu1 %v287_v27 }
  0x56   : > { %1265 = vmatmul.mubr.msk.f32.gmra.mrb[30].mxu0 %vm536_vm0, %v254_v28 }
  0x58   : > { %1192 = vmatmul.mubr.f32.gmra.mrb[24].mxu1 %v288_v29 }
  0x59   : > { %1194 = vmatprep.mubr.f32.mxu1 %v289_v30 }
  0x5c   : > { %1195 = vmatmul.mubr.f32.gmra.mrb[26].mxu1 %v290_v31 }
  0x5d   : > { %1197 = vmatprep.mubr.f32.mxu1 %v291_v32 }
  0x60   : > { %1198 = vmatmul.mubr.f32.gmra.mrb[28].mxu1 %v292_v33 }
  0x61   : > { %1200 = vmatprep.mubr.f32.mxu1 %v293_v34 }
  0x64   : > { %1201 = vmatmul.mubr.f32.gmra.mrb[30].mxu1 %v294_v35 }
  0xed   : > { %v1221_v36 = vpop.f32.mrb[0].mxu0 }
  0xee   : > { %v699_v37 = vpop.f32.mrb[1].mxu0 }
  0xf1   : > { %v1224_v38 = vpop.f32.mrb[2].mxu0 }
  0xf2   : > { %v709_v39 = vpop.f32.mrb[3].mxu0 }
  0xf5   : > { %v1227_v40 = vpop.f32.mrb[4].mxu0 }
  0xf6   : > { %v719_v41 = vpop.f32.mrb[5].mxu0 }
  0xf9   : > { %v1230_v42 = vpop.f32.mrb[6].mxu0 }
  0xfa   : > { %v729_v44 = vpop.f32.mrb[7].mxu0 }
  0xfb   : > { %v1157_v43 = vpop.f32.mrb[0].mxu1 }
  0xfc   : > { %v705_v45 = vadd.f32 %v1221_v36, %v1157_v43  ;;  %v377_v46 = vpop.f32.mrb[1].mxu1 }
  0xfd   : > { %v700_v47 = vadd.f32 %v699_v37, %v377_v46  ;;  %v1233_v49 = vpop.f32.mrb[8].mxu0 }
  0xfe   : > { %v859_v48 = vmax.f32 %v705_v45, 0.0  ;;  %v739_v52 = vpop.f32.mrb[9].mxu0 }
  0xff   : > { %v858_v50 = vmax.f32 %v700_v47, 0.0  ;;  %v1160_v51 = vpop.f32.mrb[2].mxu1 }
 0x100   : > { %891 = vst [vmem:[%s1582_s26 + $0x8] sm:$0xff] %v859_v48  ;;  %v715_v53 = vadd.f32 %v1224_v38, %v1160_v51  ;;  %v387_v54 = vpop.f32.mrb[3].mxu1 }
 0x101   : > { %890 = vst [vmem:[%s1582_s26] sm:$0xff] %v858_v50  ;;  %v710_v55 = vadd.f32 %v709_v39, %v387_v54  ;;  %v1236_v57 = vpop.f32.mrb[10].mxu0 }
 0x102   : > { %v861_v56 = vmax.f32 %v715_v53, 0.0  ;;  %v749_v60 = vpop.f32.mrb[11].mxu0 }
 0x103   : > { %v860_v58 = vmax.f32 %v710_v55, 0.0  ;;  %v1163_v59 = vpop.f32.mrb[4].mxu1 }
 0x104   : > { %893 = vst [vmem:[%s1582_s26 + $0x18] sm:$0xff] %v861_v56  ;;  %v725_v61 = vadd.f32 %v1227_v40, %v1163_v59  ;;  %v397_v62 = vpop.f32.mrb[5].mxu1 }
 0x105   : > { %892 = vst [vmem:[%s1582_s26 + $0x10] sm:$0xff] %v860_v58  ;;  %v720_v63 = vadd.f32 %v719_v41, %v397_v62  ;;  %v1239_v1 = vpop.f32.mrb[12].mxu0 }
 0x106   : > { %v863_v0 = vmax.f32 %v725_v61, 0.0  ;;  %v759_v4 = vpop.f32.mrb[13].mxu0 }
 0x107   : > { %v862_v2 = vmax.f32 %v720_v63, 0.0  ;;  %v1166_v3 = vpop.f32.mrb[6].mxu1 }
 0x108   : > { %895 = vst [vmem:[%s1582_s26 + $0x28] sm:$0xff] %v863_v0  ;;  %v735_v5 = vadd.f32 %v1230_v42, %v1166_v3  ;;  %v407_v6 = vpop.f32.mrb[7].mxu1 }
 0x109   : > { %894 = vst [vmem:[%s1582_s26 + $0x20] sm:$0xff] %v862_v2  ;;  %v730_v7 = vadd.f32 %v729_v44, %v407_v6  ;;  %v1242_v9 = vpop.f32.mrb[14].mxu0 }
 0x10a   : > { %v865_v8 = vmax.f32 %v735_v5, 0.0  ;;  %v769_v12 = vpop.f32.mrb[15].mxu0 }
 0x10b   : > { %v864_v10 = vmax.f32 %v730_v7, 0.0  ;;  %v1169_v11 = vpop.f32.mrb[8].mxu1 }
 0x10c   : > { %897 = vst [vmem:[%s1582_s26 + $0x38] sm:$0xff] %v865_v8  ;;  %v745_v13 = vadd.f32 %v1233_v49, %v1169_v11  ;;  %v417_v14 = vpop.f32.mrb[9].mxu1 }
 0x10d   : > { %896 = vst [vmem:[%s1582_s26 + $0x30] sm:$0xff] %v864_v10  ;;  %v740_v15 = vadd.f32 %v739_v52, %v417_v14  ;;  %v1245_v17 = vpop.f32.mrb[16].mxu0 }
 0x10e   : > { %v867_v16 = vmax.f32 %v745_v13, 0.0  ;;  %v779_v20 = vpop.f32.mrb[17].mxu0 }
 0x10f   : > { %v866_v18 = vmax.f32 %v740_v15, 0.0  ;;  %v1172_v19 = vpop.f32.mrb[10].mxu1 }
 0x110   : > { %899 = vst [vmem:[%s1582_s26 + $0x48] sm:$0xff] %v867_v16  ;;  %v755_v21 = vadd.f32 %v1236_v57, %v1172_v19  ;;  %v427_v22 = vpop.f32.mrb[11].mxu1 }
 0x111   : > { %898 = vst [vmem:[%s1582_s26 + $0x40] sm:$0xff] %v866_v18  ;;  %v750_v23 = vadd.f32 %v749_v60, %v427_v22  ;;  %v1248_v25 = vpop.f32.mrb[18].mxu0 }
 0x112   : > { %v869_v24 = vmax.f32 %v755_v21, 0.0  ;;  %v789_v28 = vpop.f32.mrb[19].mxu0 }
 0x113   : > { %v868_v26 = vmax.f32 %v750_v23, 0.0  ;;  %v1175_v27 = vpop.f32.mrb[12].mxu1 }
 0x114   : > { %901 = vst [vmem:[%s1582_s26 + $0x58] sm:$0xff] %v869_v24  ;;  %v765_v29 = vadd.f32 %v1239_v1, %v1175_v27  ;;  %v437_v30 = vpop.f32.mrb[13].mxu1 }
 0x115   : > { %900 = vst [vmem:[%s1582_s26 + $0x50] sm:$0xff] %v868_v26  ;;  %v760_v31 = vadd.f32 %v759_v4, %v437_v30  ;;  %v1251_v33 = vpop.f32.mrb[20].mxu0 }
 0x116   : > { %v871_v32 = vmax.f32 %v765_v29, 0.0  ;;  %v799_v36 = vpop.f32.mrb[21].mxu0 }
 0x117   : > { %v870_v34 = vmax.f32 %v760_v31, 0.0  ;;  %v1178_v35 = vpop.f32.mrb[14].mxu1 }
 0x118   : > { %903 = vst [vmem:[%s1582_s26 + $0x68] sm:$0xff] %v871_v32  ;;  %v775_v37 = vadd.f32 %v1242_v9, %v1178_v35  ;;  %v447_v38 = vpop.f32.mrb[15].mxu1 }
 0x119   : > { %902 = vst [vmem:[%s1582_s26 + $0x60] sm:$0xff] %v870_v34  ;;  %v770_v39 = vadd.f32 %v769_v12, %v447_v38  ;;  %v1254_v41 = vpop.f32.mrb[22].mxu0 }
 0x11a   : > { %v873_v40 = vmax.f32 %v775_v37, 0.0  ;;  %v809_v44 = vpop.f32.mrb[23].mxu0 }
 0x11b   : > { %v872_v42 = vmax.f32 %v770_v39, 0.0  ;;  %v1181_v43 = vpop.f32.mrb[16].mxu1 }
 0x11c   : > { %905 = vst [vmem:[%s1582_s26 + $0x78] sm:$0xff] %v873_v40  ;;  %v785_v45 = vadd.f32 %v1245_v17, %v1181_v43  ;;  %v457_v46 = vpop.f32.mrb[17].mxu1 }
 0x11d   : > { %904 = vst [vmem:[%s1582_s26 + $0x70] sm:$0xff] %v872_v42  ;;  %v780_v47 = vadd.f32 %v779_v20, %v457_v46  ;;  %v1257_v49 = vpop.f32.mrb[24].mxu0 }
 0x11e   : > { %v875_v48 = vmax.f32 %v785_v45, 0.0  ;;  %v819_v52 = vpop.f32.mrb[25].mxu0 }
 0x11f   : > { %v874_v50 = vmax.f32 %v780_v47, 0.0  ;;  %v1184_v51 = vpop.f32.mrb[18].mxu1 }
 0x120   : > { %907 = vst [vmem:[%s1582_s26 + $0x88] sm:$0xff] %v875_v48  ;;  %v795_v53 = vadd.f32 %v1248_v25, %v1184_v51  ;;  %v467_v54 = vpop.f32.mrb[19].mxu1 }
 0x121   : > { %906 = vst [vmem:[%s1582_s26 + $0x80] sm:$0xff] %v874_v50  ;;  %v790_v55 = vadd.f32 %v789_v28, %v467_v54  ;;  %v1260_v57 = vpop.f32.mrb[26].mxu0 }
 0x122   : > { %v877_v56 = vmax.f32 %v795_v53, 0.0  ;;  %v829_v60 = vpop.f32.mrb[27].mxu0 }
 0x123   : > { %v876_v58 = vmax.f32 %v790_v55, 0.0  ;;  %v1187_v59 = vpop.f32.mrb[20].mxu1 }
 0x124   : > { %909 = vst [vmem:[%s1582_s26 + $0x98] sm:$0xff] %v877_v56  ;;  %v805_v61 = vadd.f32 %v1251_v33, %v1187_v59  ;;  %v477_v62 = vpop.f32.mrb[21].mxu1 }
 0x125   : > { %908 = vst [vmem:[%s1582_s26 + $0x90] sm:$0xff] %v876_v58  ;;  %v800_v63 = vadd.f32 %v799_v36, %v477_v62  ;;  %v1263_v1 = vpop.f32.mrb[28].mxu0 }
 0x126   : > { %v879_v0 = vmax.f32 %v805_v61, 0.0  ;;  %v839_v4 = vpop.f32.mrb[29].mxu0 }
 0x127   : > { %v878_v2 = vmax.f32 %v800_v63, 0.0  ;;  %v1190_v3 = vpop.f32.mrb[22].mxu1 }
 0x128   : > { %911 = vst [vmem:[%s1582_s26 + $0xa8] sm:$0xff] %v879_v0  ;;  %v815_v5 = vadd.f32 %v1254_v41, %v1190_v3  ;;  %v487_v6 = vpop.f32.mrb[23].mxu1 }
 0x129   : > { %910 = vst [vmem:[%s1582_s26 + $0xa0] sm:$0xff] %v878_v2  ;;  %v810_v7 = vadd.f32 %v809_v44, %v487_v6  ;;  %v1266_v9 = vpop.f32.mrb[30].mxu0 }
 0x12a   : > { %v881_v8 = vmax.f32 %v815_v5, 0.0  ;;  %v849_v12 = vpop.f32.mrb[31].mxu0 }
 0x12b   : > { %v880_v10 = vmax.f32 %v810_v7, 0.0  ;;  %v1193_v11 = vpop.f32.mrb[24].mxu1 }
 0x12c   : > { %913 = vst [vmem:[%s1582_s26 + $0xb8] sm:$0xff] %v881_v8  ;;  %v825_v13 = vadd.f32 %v1257_v49, %v1193_v11  ;;  %v497_v14 = vpop.f32.mrb[25].mxu1 }
 0x12d   : > { %912 = vst [vmem:[%s1582_s26 + $0xb0] sm:$0xff] %v880_v10  ;;  %v820_v15 = vadd.f32 %v819_v52, %v497_v14 }
 0x12e   : > { %v883_v16 = vmax.f32 %v825_v13, 0.0 }
 0x12f   : > { %v882_v17 = vmax.f32 %v820_v15, 0.0  ;;  %v1196_v18 = vpop.f32.mrb[26].mxu1 }
 0x130   : > { %915 = vst [vmem:[%s1582_s26 + $0xc8] sm:$0xff] %v883_v16  ;;  %v835_v19 = vadd.f32 %v1260_v57, %v1196_v18  ;;  %v507_v20 = vpop.f32.mrb[27].mxu1 }
 0x131   : > { %914 = vst [vmem:[%s1582_s26 + $0xc0] sm:$0xff] %v882_v17  ;;  %v830_v21 = vadd.f32 %v829_v60, %v507_v20 }
 0x132   : > { %v885_v22 = vmax.f32 %v835_v19, 0.0 }
 0x133   : > { %v884_v23 = vmax.f32 %v830_v21, 0.0  ;;  %v1199_v24 = vpop.f32.mrb[28].mxu1 }
 0x134   : > { %917 = vst [vmem:[%s1582_s26 + $0xd8] sm:$0xff] %v885_v22  ;;  %v845_v25 = vadd.f32 %v1263_v1, %v1199_v24  ;;  %v517_v26 = vpop.f32.mrb[29].mxu1 }
 0x135   : > { %916 = vst [vmem:[%s1582_s26 + $0xd0] sm:$0xff] %v884_v23  ;;  %v840_v27 = vadd.f32 %v839_v4, %v517_v26 }
 0x136   : > { %v887_v28 = vmax.f32 %v845_v25, 0.0 }
 0x137   : > { %v886_v29 = vmax.f32 %v840_v27, 0.0  ;;  %v1202_v30 = vpop.f32.mrb[30].mxu1 }
 0x138   : > { %919 = vst [vmem:[%s1582_s26 + $0xe8] sm:$0xff] %v887_v28  ;;  %v855_v31 = vadd.f32 %v1266_v9, %v1202_v30  ;;  %v527_v32 = vpop.f32.mrb[31].mxu1 }
 0x139   : > { %918 = vst [vmem:[%s1582_s26 + $0xe0] sm:$0xff] %v886_v29  ;;  %v850_v33 = vadd.f32 %v849_v12, %v527_v32 }
 0x13a   : > { %v889_v34 = vmax.f32 %v855_v31, 0.0 }
 0x13b   : > { %v888_v35 = vmax.f32 %v850_v33, 0.0 }
 0x13c   : > { %921 = vst [vmem:[%s1582_s26 + $0xf8] sm:$0xff] %v889_v34 }
 0x13d   : > { %920 = vst [vmem:[%s1582_s26 + $0xf0] sm:$0xff] %v888_v35 }
 0x13e PF: > { %s14_s15 = sadd.s32 1, %s1361_s15  }
 0x13f   : > { %p11_p4 = scmp.ge.s32.totalorder %s14_s15, 6  }
 0x141   :  { %13 = sbr.rel (!%p11_p4) target bundleno = 1 (0x1), region = 69 }

</bundles_post_ra>
